<compile_context>
chip_gen: v6e
topology: v6e:2x2x1
jax: 0.10.0
libtpu: 0.0.40
codegen_flags: <defaults>
</compile_context>

<pallas_src>
import functools

import jax
import jax.numpy as jnp
import numpy as np
from jax.experimental import pallas as pl
from jax.experimental.pallas import tpu as pltpu

_LANE = 128
_SUB = 8


def _round_up(x, m):
    return (x + m - 1) // m * m


# --------------------------- n_dim == 1 fast path (VPU) ----------------------


def _p1basis_vpu_kernel(w1_ref, b1_ref, w2_ref, b2_ref, x_ref, o_ref, *, n_basis):
    """x_ref: (rows, 128) f32; o_ref: (n_basis, rows, 128).

    Weights / biases are SMEM scalars (n_basis of each); every basis function
    is a broadcast FMA + min/max and a full lane-dense store.  No MXU.
    """
    x = x_ref[...]                                   # (rows, 128) f32
    for j in range(n_basis):                         # tiny static unroll (8)
        vl = x * w1_ref[j] + b1_ref[j]
        vr = x * w2_ref[j] + b2_ref[j]
        o_ref[j] = jnp.maximum(jnp.minimum(vl, vr), 0.0).astype(o_ref.dtype)


def _forward_ndim1(x, weight1, bias1, weight2, bias2):
    N = x.shape[0]
    n_basis = weight1.shape[0]
    out_dtype = x.dtype

    # Pack the batch densely onto (sublane, lane): rows of 128 points each.
    rows = pl.cdiv(N, _LANE)
    # ~8192 points per grid step; at least one (8, 128) tile.  For large N
    # this yields a multi-step "parallel" grid (both v7x TensorCores busy);
    # the per-step working set (~<0.3 MiB) is far below VMEM on any chip.
    bm_rows = min(64, _round_up(rows, _SUB))
    rows_pad = _round_up(rows, bm_rows)
    n_pad = rows_pad * _LANE
    grid = (rows_pad // bm_rows,)

    xf = jnp.ravel(x).astype(jnp.float32)
    if n_pad != N:
        xf = jnp.pad(xf, (0, n_pad - N))
    x2 = xf.reshape(rows_pad, _LANE)

    w1s = jnp.asarray(weight1, jnp.float32)[:, 0]    # (n_basis,)
    w2s = jnp.asarray(weight2, jnp.float32)[:, 0]
    b1s = jnp.asarray(bias1, jnp.float32)
    b2s = jnp.asarray(bias2, jnp.float32)

    smem_spec = pl.BlockSpec(memory_space=pltpu.MemorySpace.SMEM)

    out3 = pl.pallas_call(
        functools.partial(_p1basis_vpu_kernel, n_basis=n_basis),
        out_shape=jax.ShapeDtypeStruct((n_basis, rows_pad, _LANE), out_dtype),
        grid=grid,
        in_specs=[
            smem_spec, smem_spec, smem_spec, smem_spec,            # w1 b1 w2 b2
            pl.BlockSpec((bm_rows, _LANE), lambda i: (i, 0)),      # x tile
        ],
        out_specs=pl.BlockSpec((n_basis, bm_rows, _LANE), lambda i: (0, i, 0)),
        compiler_params=pltpu.CompilerParams(
            dimension_semantics=("parallel",)),
    )(w1s, b1s, w2s, b2s, x2)

    # (n_basis, n_pad) -> (N, n_basis): wrapper-side layout plumbing only.
    return out3.reshape(n_basis, n_pad)[:, :N].T


# --------------------------- n_dim > 1 fallback (MXU) ------------------------


def _p1basis_mxu_kernel(x_ref, w_ref, b_ref, o_ref, *, n_basis):
    # Single fused matmul: [W1^T | W2^T] -> split, then max(min(vl, vr), 0).
    v = jnp.dot(x_ref[...], w_ref[...],
                preferred_element_type=jnp.float32) + b_ref[...]
    vl = v[:, :n_basis]
    vr = v[:, n_basis:]
    o_ref[...] = jnp.maximum(jnp.minimum(vl, vr), 0.0).astype(o_ref.dtype)


def _forward_general(x, weight1, bias1, weight2, bias2, *, bm=512):
    N, n_dim = x.shape
    n_basis = weight1.shape[0]

    bm = min(bm, _round_up(N, _SUB))
    n_pad = _round_up(N, bm)
    xp = jnp.pad(x.astype(jnp.float32), ((0, n_pad - N), (0, 0)))

    wcat = jnp.concatenate(
        [jnp.asarray(weight1, jnp.float32).T,
         jnp.asarray(weight2, jnp.float32).T], axis=1)              # (n_dim, 2*nb)
    bcat = jnp.concatenate(
        [jnp.asarray(bias1, jnp.float32),
         jnp.asarray(bias2, jnp.float32)]).reshape(1, 2 * n_basis)  # (1, 2*nb)

    out = pl.pallas_call(
        functools.partial(_p1basis_mxu_kernel, n_basis=n_basis),
        out_shape=jax.ShapeDtypeStruct((n_pad, n_basis), x.dtype),
        grid=(n_pad // bm,),
        in_specs=[
            pl.BlockSpec((bm, n_dim), lambda i: (i, 0)),
            pl.BlockSpec((n_dim, 2 * n_basis), lambda i: (0, 0)),
            pl.BlockSpec((1, 2 * n_basis), lambda i: (0, 0)),
        ],
        out_specs=pl.BlockSpec((bm, n_basis), lambda i: (i, 0)),
        compiler_params=pltpu.CompilerParams(
            dimension_semantics=("parallel",)),
    )(xp, wcat, bcat)
    return out[:N]


# ----------------------------------- API -------------------------------------


def p1basis_forward(x, weight1, bias1, weight2, bias2):
    """x: (N, n_dim); weight*: (n_basis, n_dim); bias*: (n_basis,)."""
    x = jnp.asarray(x)
    _, n_dim = x.shape
    if n_dim == 1:
        return _forward_ndim1(x, weight1, bias1, weight2, bias2)
    return _forward_general(x, weight1, bias1, weight2, bias2)


def make_p1basis_params(n_neurons=8, a=0.0, b=1.0, n_dim=1, dtype=jnp.float32):
    """Deterministic parameter construction mirroring P1Basis.__init__."""
    n_basis = n_neurons
    pos = jnp.linspace(a, b, n_neurons, dtype=dtype)                      # (n_neurons,)
    xpos = jnp.concatenate([
        (2.0 * pos[0] - pos[1])[None],
        pos,
        (2.0 * pos[-1] - pos[-2])[None],
    ])                                                                    # (n_neurons+2,)
    h = xpos[1:] - xpos[:-1]                                              # (n_neurons+1,)

    bias1 = xpos[2:] / h[1:]                                              # (n_basis,)
    weight1 = jnp.zeros((n_basis, n_dim), dtype=dtype).at[:, 0].set(-1.0 / h[1:])
    bias2 = -xpos[:-2] / h[:-1]                                           # (n_basis,)
    weight2 = jnp.zeros((n_basis, n_dim), dtype=dtype).at[:, 0].set(1.0 / h[:-1])
    return weight1, bias1, weight2, bias2


def _reference_forward(x, w1, b1, w2, b2):
    """Pure-JAX reference of P1Basis.forward (torch F.linear semantics)."""
    vl = x @ w1.T + b1
    vr = x @ w2.T + b2
    return jnp.maximum(vl - jnp.maximum(vl - vr, 0.0), 0.0)


if __name__ == "__main__":
    n_neurons = 8     # n_basis = 8
    n_dim = 1
    a, b = 0.0, 1.0

    w1, b1_, w2, b2_ = make_p1basis_params(n_neurons=n_neurons, a=a, b=b, n_dim=n_dim)

    key = jax.random.PRNGKey(0)
    for N in (256, 250):   # aligned and ragged batch sizes (padding path)
        key, sub = jax.random.split(key)
        x = jax.random.uniform(sub, (N, n_dim), dtype=jnp.float32, minval=a, maxval=b)
        out = jax.block_until_ready(p1basis_forward(x, w1, b1_, w2, b2_))
        ref = _reference_forward(x, w1, b1_, w2, b2_)
        np.testing.assert_allclose(np.asarray(out), np.asarray(ref),
                                   rtol=1e-5, atol=1e-5)

    # TODO(synk): __init__-time autograd of phi w.r.t. x (phi_x_int), the
    # Gauss-Legendre quadrature bookkeeping and plotting are host-side setup,
    # not part of the forward hot path, so they are not reproduced here.
    print("KERNEL_OK")
</pallas_src>

<mosaic_0001>
module attributes {stable_mosaic.version = 11 : i64} {
  func.func @_p1basis_vpu_kernel(%arg0: i32, %arg1: memref<8xf32, #tpu.memory_space<smem>>, %arg2: memref<8xf32, #tpu.memory_space<smem>>, %arg3: memref<8xf32, #tpu.memory_space<smem>>, %arg4: memref<8xf32, #tpu.memory_space<smem>>, %arg5: memref<8x128xf32, #tpu.memory_space<vmem>>, %arg6: memref<8x8x128xf32, #tpu.memory_space<vmem>>) attributes {dimension_semantics = [#tpu.dimension_semantics<parallel>], iteration_bounds = array<i64: 1>, scalar_prefetch = 0 : i64, scratch_operands = 0 : i64, tpu.core_type = #tpu.core_type<tc>, window_params = [{transform_indices = @transform_0, window_bounds = array<i64: 8>}, {transform_indices = @transform_1, window_bounds = array<i64: 8>}, {transform_indices = @transform_2, window_bounds = array<i64: 8>}, {transform_indices = @transform_3, window_bounds = array<i64: 8>}, {transform_indices = @transform_4, window_bounds = array<i64: 8, 128>}, {transform_indices = @transform_5, window_bounds = array<i64: 8, 8, 128>}]} {
    %c0 = arith.constant 0 : index
    %c0_0 = arith.constant 0 : index
    %0 = vector.load %arg5[%c0, %c0_0] : memref<8x128xf32, #tpu.memory_space<vmem>>, vector<8x128xf32>
    %c0_1 = arith.constant 0 : index
    %1 = memref.load %arg1[%c0_1] : memref<8xf32, #tpu.memory_space<smem>>
    %2 = vector.broadcast %1 : f32 to vector<8x128xf32>
    %3 = arith.mulf %0, %2 : vector<8x128xf32>
    %c0_2 = arith.constant 0 : index
    %4 = memref.load %arg2[%c0_2] : memref<8xf32, #tpu.memory_space<smem>>
    %5 = vector.broadcast %4 : f32 to vector<8x128xf32>
    %6 = arith.addf %3, %5 : vector<8x128xf32>
    %c0_3 = arith.constant 0 : index
    %7 = memref.load %arg3[%c0_3] : memref<8xf32, #tpu.memory_space<smem>>
    %8 = vector.broadcast %7 : f32 to vector<8x128xf32>
    %9 = arith.mulf %0, %8 : vector<8x128xf32>
    %c0_4 = arith.constant 0 : index
    %10 = memref.load %arg4[%c0_4] : memref<8xf32, #tpu.memory_space<smem>>
    %11 = vector.broadcast %10 : f32 to vector<8x128xf32>
    %12 = arith.addf %9, %11 : vector<8x128xf32>
    %13 = arith.minimumf %6, %12 : vector<8x128xf32>
    %cst = arith.constant 0.000000e+00 : f32
    %14 = vector.broadcast %cst : f32 to vector<8x128xf32>
    %15 = arith.maximumf %13, %14 : vector<8x128xf32>
    %c0_5 = arith.constant 0 : index
    %c0_6 = arith.constant 0 : index
    %c0_7 = arith.constant 0 : index
    %16 = vector.load %arg6[%c0_5, %c0_6, %c0_7] : memref<8x8x128xf32, #tpu.memory_space<vmem>>, vector<1x8x128xf32>
    %17 = vector.shape_cast %16 : vector<1x8x128xf32> to vector<8x128xf32>
    %18 = vector.shape_cast %15 : vector<8x128xf32> to vector<1x8x128xf32>
    tpu.vector_store %arg6[%c0_5, %c0_6, %c0_7], %18 {strides = array<i32>} : memref<8x8x128xf32, #tpu.memory_space<vmem>>, vector<1x8x128xf32>,
    %c1 = arith.constant 1 : index
    %19 = memref.load %arg1[%c1] : memref<8xf32, #tpu.memory_space<smem>>
    %20 = vector.broadcast %19 : f32 to vector<8x128xf32>
    %21 = arith.mulf %0, %20 : vector<8x128xf32>
    %c1_8 = arith.constant 1 : index
    %22 = memref.load %arg2[%c1_8] : memref<8xf32, #tpu.memory_space<smem>>
    %23 = vector.broadcast %22 : f32 to vector<8x128xf32>
    %24 = arith.addf %21, %23 : vector<8x128xf32>
    %c1_9 = arith.constant 1 : index
    %25 = memref.load %arg3[%c1_9] : memref<8xf32, #tpu.memory_space<smem>>
    %26 = vector.broadcast %25 : f32 to vector<8x128xf32>
    %27 = arith.mulf %0, %26 : vector<8x128xf32>
    %c1_10 = arith.constant 1 : index
    %28 = memref.load %arg4[%c1_10] : memref<8xf32, #tpu.memory_space<smem>>
    %29 = vector.broadcast %28 : f32 to vector<8x128xf32>
    %30 = arith.addf %27, %29 : vector<8x128xf32>
    %31 = arith.minimumf %24, %30 : vector<8x128xf32>
    %cst_11 = arith.constant 0.000000e+00 : f32
    %32 = vector.broadcast %cst_11 : f32 to vector<8x128xf32>
    %33 = arith.maximumf %31, %32 : vector<8x128xf32>
    %c1_12 = arith.constant 1 : index
    %c0_13 = arith.constant 0 : index
    %c0_14 = arith.constant 0 : index
    %34 = vector.load %arg6[%c1_12, %c0_13, %c0_14] : memref<8x8x128xf32, #tpu.memory_space<vmem>>, vector<1x8x128xf32>
    %35 = vector.shape_cast %34 : vector<1x8x128xf32> to vector<8x128xf32>
    %36 = vector.shape_cast %33 : vector<8x128xf32> to vector<1x8x128xf32>
    tpu.vector_store %arg6[%c1_12, %c0_13, %c0_14], %36 {strides = array<i32>} : memref<8x8x128xf32, #tpu.memory_space<vmem>>, vector<1x8x128xf32>,
    %c2 = arith.constant 2 : index
    %37 = memref.load %arg1[%c2] : memref<8xf32, #tpu.memory_space<smem>>
    %38 = vector.broadcast %37 : f32 to vector<8x128xf32>
    %39 = arith.mulf %0, %38 : vector<8x128xf32>
    %c2_15 = arith.constant 2 : index
    %40 = memref.load %arg2[%c2_15] : memref<8xf32, #tpu.memory_space<smem>>
    %41 = vector.broadcast %40 : f32 to vector<8x128xf32>
    %42 = arith.addf %39, %41 : vector<8x128xf32>
    %c2_16 = arith.constant 2 : index
    %43 = memref.load %arg3[%c2_16] : memref<8xf32, #tpu.memory_space<smem>>
    %44 = vector.broadcast %43 : f32 to vector<8x128xf32>
    %45 = arith.mulf %0, %44 : vector<8x128xf32>
    %c2_17 = arith.constant 2 : index
    %46 = memref.load %arg4[%c2_17] : memref<8xf32, #tpu.memory_space<smem>>
    %47 = vector.broadcast %46 : f32 to vector<8x128xf32>
    %48 = arith.addf %45, %47 : vector<8x128xf32>
    %49 = arith.minimumf %42, %48 : vector<8x128xf32>
    %cst_18 = arith.constant 0.000000e+00 : f32
    %50 = vector.broadcast %cst_18 : f32 to vector<8x128xf32>
    %51 = arith.maximumf %49, %50 : vector<8x128xf32>
    %c2_19 = arith.constant 2 : index
    %c0_20 = arith.constant 0 : index
    %c0_21 = arith.constant 0 : index
    %52 = vector.load %arg6[%c2_19, %c0_20, %c0_21] : memref<8x8x128xf32, #tpu.memory_space<vmem>>, vector<1x8x128xf32>
    %53 = vector.shape_cast %52 : vector<1x8x128xf32> to vector<8x128xf32>
    %54 = vector.shape_cast %51 : vector<8x128xf32> to vector<1x8x128xf32>
    tpu.vector_store %arg6[%c2_19, %c0_20, %c0_21], %54 {strides = array<i32>} : memref<8x8x128xf32, #tpu.memory_space<vmem>>, vector<1x8x128xf32>,
    %c3 = arith.constant 3 : index
    %55 = memref.load %arg1[%c3] : memref<8xf32, #tpu.memory_space<smem>>
    %56 = vector.broadcast %55 : f32 to vector<8x128xf32>
    %57 = arith.mulf %0, %56 : vector<8x128xf32>
    %c3_22 = arith.constant 3 : index
    %58 = memref.load %arg2[%c3_22] : memref<8xf32, #tpu.memory_space<smem>>
    %59 = vector.broadcast %58 : f32 to vector<8x128xf32>
    %60 = arith.addf %57, %59 : vector<8x128xf32>
    %c3_23 = arith.constant 3 : index
    %61 = memref.load %arg3[%c3_23] : memref<8xf32, #tpu.memory_space<smem>>
    %62 = vector.broadcast %61 : f32 to vector<8x128xf32>
    %63 = arith.mulf %0, %62 : vector<8x128xf32>
    %c3_24 = arith.constant 3 : index
    %64 = memref.load %arg4[%c3_24] : memref<8xf32, #tpu.memory_space<smem>>
    %65 = vector.broadcast %64 : f32 to vector<8x128xf32>
    %66 = arith.addf %63, %65 : vector<8x128xf32>
    %67 = arith.minimumf %60, %66 : vector<8x128xf32>
    %cst_25 = arith.constant 0.000000e+00 : f32
    %68 = vector.broadcast %cst_25 : f32 to vector<8x128xf32>
    %69 = arith.maximumf %67, %68 : vector<8x128xf32>
    %c3_26 = arith.constant 3 : index
    %c0_27 = arith.constant 0 : index
    %c0_28 = arith.constant 0 : index
    %70 = vector.load %arg6[%c3_26, %c0_27, %c0_28] : memref<8x8x128xf32, #tpu.memory_space<vmem>>, vector<1x8x128xf32>
    %71 = vector.shape_cast %70 : vector<1x8x128xf32> to vector<8x128xf32>
    %72 = vector.shape_cast %69 : vector<8x128xf32> to vector<1x8x128xf32>
    tpu.vector_store %arg6[%c3_26, %c0_27, %c0_28], %72 {strides = array<i32>} : memref<8x8x128xf32, #tpu.memory_space<vmem>>, vector<1x8x128xf32>,
    %c4 = arith.constant 4 : index
    %73 = memref.load %arg1[%c4] : memref<8xf32, #tpu.memory_space<smem>>
    %74 = vector.broadcast %73 : f32 to vector<8x128xf32>
    %75 = arith.mulf %0, %74 : vector<8x128xf32>
    %c4_29 = arith.constant 4 : index
    %76 = memref.load %arg2[%c4_29] : memref<8xf32, #tpu.memory_space<smem>>
    %77 = vector.broadcast %76 : f32 to vector<8x128xf32>
    %78 = arith.addf %75, %77 : vector<8x128xf32>
    %c4_30 = arith.constant 4 : index
    %79 = memref.load %arg3[%c4_30] : memref<8xf32, #tpu.memory_space<smem>>
    %80 = vector.broadcast %79 : f32 to vector<8x128xf32>
    %81 = arith.mulf %0, %80 : vector<8x128xf32>
    %c4_31 = arith.constant 4 : index
    %82 = memref.load %arg4[%c4_31] : memref<8xf32, #tpu.memory_space<smem>>
    %83 = vector.broadcast %82 : f32 to vector<8x128xf32>
    %84 = arith.addf %81, %83 : vector<8x128xf32>
    %85 = arith.minimumf %78, %84 : vector<8x128xf32>
    %cst_32 = arith.constant 0.000000e+00 : f32
    %86 = vector.broadcast %cst_32 : f32 to vector<8x128xf32>
    %87 = arith.maximumf %85, %86 : vector<8x128xf32>
    %c4_33 = arith.constant 4 : index
    %c0_34 = arith.constant 0 : index
    %c0_35 = arith.constant 0 : index
    %88 = vector.load %arg6[%c4_33, %c0_34, %c0_35] : memref<8x8x128xf32, #tpu.memory_space<vmem>>, vector<1x8x128xf32>
    %89 = vector.shape_cast %88 : vector<1x8x128xf32> to vector<8x128xf32>
    %90 = vector.shape_cast %87 : vector<8x128xf32> to vector<1x8x128xf32>
    tpu.vector_store %arg6[%c4_33, %c0_34, %c0_35], %90 {strides = array<i32>} : memref<8x8x128xf32, #tpu.memory_space<vmem>>, vector<1x8x128xf32>,
    %c5 = arith.constant 5 : index
    %91 = memref.load %arg1[%c5] : memref<8xf32, #tpu.memory_space<smem>>
    %92 = vector.broadcast %91 : f32 to vector<8x128xf32>
    %93 = arith.mulf %0, %92 : vector<8x128xf32>
    %c5_36 = arith.constant 5 : index
    %94 = memref.load %arg2[%c5_36] : memref<8xf32, #tpu.memory_space<smem>>
    %95 = vector.broadcast %94 : f32 to vector<8x128xf32>
    %96 = arith.addf %93, %95 : vector<8x128xf32>
    %c5_37 = arith.constant 5 : index
    %97 = memref.load %arg3[%c5_37] : memref<8xf32, #tpu.memory_space<smem>>
    %98 = vector.broadcast %97 : f32 to vector<8x128xf32>
    %99 = arith.mulf %0, %98 : vector<8x128xf32>
    %c5_38 = arith.constant 5 : index
    %100 = memref.load %arg4[%c5_38] : memref<8xf32, #tpu.memory_space<smem>>
    %101 = vector.broadcast %100 : f32 to vector<8x128xf32>
    %102 = arith.addf %99, %101 : vector<8x128xf32>
    %103 = arith.minimumf %96, %102 : vector<8x128xf32>
    %cst_39 = arith.constant 0.000000e+00 : f32
    %104 = vector.broadcast %cst_39 : f32 to vector<8x128xf32>
    %105 = arith.maximumf %103, %104 : vector<8x128xf32>
    %c5_40 = arith.constant 5 : index
    %c0_41 = arith.constant 0 : index
    %c0_42 = arith.constant 0 : index
    %106 = vector.load %arg6[%c5_40, %c0_41, %c0_42] : memref<8x8x128xf32, #tpu.memory_space<vmem>>, vector<1x8x128xf32>
    %107 = vector.shape_cast %106 : vector<1x8x128xf32> to vector<8x128xf32>
    %108 = vector.shape_cast %105 : vector<8x128xf32> to vector<1x8x128xf32>
    tpu.vector_store %arg6[%c5_40, %c0_41, %c0_42], %108 {strides = array<i32>} : memref<8x8x128xf32, #tpu.memory_space<vmem>>, vector<1x8x128xf32>,
    %c6 = arith.constant 6 : index
    %109 = memref.load %arg1[%c6] : memref<8xf32, #tpu.memory_space<smem>>
    %110 = vector.broadcast %109 : f32 to vector<8x128xf32>
    %111 = arith.mulf %0, %110 : vector<8x128xf32>
    %c6_43 = arith.constant 6 : index
    %112 = memref.load %arg2[%c6_43] : memref<8xf32, #tpu.memory_space<smem>>
    %113 = vector.broadcast %112 : f32 to vector<8x128xf32>
    %114 = arith.addf %111, %113 : vector<8x128xf32>
    %c6_44 = arith.constant 6 : index
    %115 = memref.load %arg3[%c6_44] : memref<8xf32, #tpu.memory_space<smem>>
    %116 = vector.broadcast %115 : f32 to vector<8x128xf32>
    %117 = arith.mulf %0, %116 : vector<8x128xf32>
    %c6_45 = arith.constant 6 : index
    %118 = memref.load %arg4[%c6_45] : memref<8xf32, #tpu.memory_space<smem>>
    %119 = vector.broadcast %118 : f32 to vector<8x128xf32>
    %120 = arith.addf %117, %119 : vector<8x128xf32>
    %121 = arith.minimumf %114, %120 : vector<8x128xf32>
    %cst_46 = arith.constant 0.000000e+00 : f32
    %122 = vector.broadcast %cst_46 : f32 to vector<8x128xf32>
    %123 = arith.maximumf %121, %122 : vector<8x128xf32>
    %c6_47 = arith.constant 6 : index
    %c0_48 = arith.constant 0 : index
    %c0_49 = arith.constant 0 : index
    %124 = vector.load %arg6[%c6_47, %c0_48, %c0_49] : memref<8x8x128xf32, #tpu.memory_space<vmem>>, vector<1x8x128xf32>
    %125 = vector.shape_cast %124 : vector<1x8x128xf32> to vector<8x128xf32>
    %126 = vector.shape_cast %123 : vector<8x128xf32> to vector<1x8x128xf32>
    tpu.vector_store %arg6[%c6_47, %c0_48, %c0_49], %126 {strides = array<i32>} : memref<8x8x128xf32, #tpu.memory_space<vmem>>, vector<1x8x128xf32>,
    %c7 = arith.constant 7 : index
    %127 = memref.load %arg1[%c7] : memref<8xf32, #tpu.memory_space<smem>>
    %128 = vector.broadcast %127 : f32 to vector<8x128xf32>
    %129 = arith.mulf %0, %128 : vector<8x128xf32>
    %c7_50 = arith.constant 7 : index
    %130 = memref.load %arg2[%c7_50] : memref<8xf32, #tpu.memory_space<smem>>
    %131 = vector.broadcast %130 : f32 to vector<8x128xf32>
    %132 = arith.addf %129, %131 : vector<8x128xf32>
    %c7_51 = arith.constant 7 : index
    %133 = memref.load %arg3[%c7_51] : memref<8xf32, #tpu.memory_space<smem>>
    %134 = vector.broadcast %133 : f32 to vector<8x128xf32>
    %135 = arith.mulf %0, %134 : vector<8x128xf32>
    %c7_52 = arith.constant 7 : index
    %136 = memref.load %arg4[%c7_52] : memref<8xf32, #tpu.memory_space<smem>>
    %137 = vector.broadcast %136 : f32 to vector<8x128xf32>
    %138 = arith.addf %135, %137 : vector<8x128xf32>
    %139 = arith.minimumf %132, %138 : vector<8x128xf32>
    %cst_53 = arith.constant 0.000000e+00 : f32
    %140 = vector.broadcast %cst_53 : f32 to vector<8x128xf32>
    %141 = arith.maximumf %139, %140 : vector<8x128xf32>
    %c7_54 = arith.constant 7 : index
    %c0_55 = arith.constant 0 : index
    %c0_56 = arith.constant 0 : index
    %142 = vector.load %arg6[%c7_54, %c0_55, %c0_56] : memref<8x8x128xf32, #tpu.memory_space<vmem>>, vector<1x8x128xf32>
    %143 = vector.shape_cast %142 : vector<1x8x128xf32> to vector<8x128xf32>
    %144 = vector.shape_cast %141 : vector<8x128xf32> to vector<1x8x128xf32>
    tpu.vector_store %arg6[%c7_54, %c0_55, %c0_56], %144 {strides = array<i32>} : memref<8x8x128xf32, #tpu.memory_space<vmem>>, vector<1x8x128xf32>,
    return
  }
  func.func @transform_0(%arg0: i32) -> i32 {
    %c0_i32 = arith.constant 0 : i32
    %c0_i32_0 = arith.constant 0 : i32
    return %c0_i32 : i32
  }
  func.func @transform_1(%arg0: i32) -> i32 {
    %c0_i32 = arith.constant 0 : i32
    %c0_i32_0 = arith.constant 0 : i32
    return %c0_i32 : i32
  }
  func.func @transform_2(%arg0: i32) -> i32 {
    %c0_i32 = arith.constant 0 : i32
    %c0_i32_0 = arith.constant 0 : i32
    return %c0_i32 : i32
  }
  func.func @transform_3(%arg0: i32) -> i32 {
    %c0_i32 = arith.constant 0 : i32
    %c0_i32_0 = arith.constant 0 : i32
    return %c0_i32 : i32
  }
  func.func @transform_4(%arg0: i32) -> (i32, i32) {
    %c0_i32 = arith.constant 0 : i32
    %c0_i32_0 = arith.constant 0 : i32
    return %arg0, %c0_i32 : i32, i32
  }
  func.func @transform_5(%arg0: i32) -> (i32, i32, i32) {
    %c0_i32 = arith.constant 0 : i32
    %c0_i32_0 = arith.constant 0 : i32
    %c0_i32_1 = arith.constant 0 : i32
    return %c0_i32, %arg0, %c0_i32_0 : i32, i32, i32
  }
}

</mosaic_0001>

<bundles_post_ra>
// kernel: tpu_custom_call.1
= control target key start
LH: loop header
LB: loop body
LE: loop exit
PB: predicated region body
PF: predicated region fallthrough
CT: control target
= control target key end

     0   :  { %10 = vsyncpa [#allocation5], 0  ;;  %s431_s0 = inlined_call_operand.hbm [shape: f32[8], index: 0, kind: input, shape index: {}]   ;;  %s432_s1 = inlined_call_operand.vmem [shape: f32[8], index: 1, kind: input, shape index: {}]   ;;  %s433_s2 = inlined_call_operand.vmem [shape: f32[8], index: 2, kind: input, shape index: {}]   ;;  %s434_s3 = inlined_call_operand.vmem [shape: f32[8], index: 3, kind: input, shape index: {}]   ;;  %s435_s4 = inlined_call_operand.hbm [shape: f32[8,128], index: 4, kind: input, shape index: {}]   ;;  %s436_s5 = inlined_call_operand.hbm [shape: f32[8,8,128], index: 5, kind: output, shape index: {}]  }
   0x1   :  { %11 = vsyncpa [#allocation6], 0 }
   0x2   :  { %12 = vsyncpa [#allocation9], 0 }
   0x3   :  { %13 = vsyncpa [#allocation3], 0  ;;  %s39_s20 = sshll.u32 %s433_s2, 4  ;;  %s40_s20 = int_to_ptr.vmem [resolvable:$true] %s39_s20 }
   0x4   :  { %14 = vsyncpa [#allocation4], 0  ;;  %s263_s21 = scalar_lea.vmem %s40_s20, 16  ;;  %p268_p1 = scmp.lt.s32.totalorder %s40_s20, %s40_s20 }
   0x5   :  { %p264_p0 = scmp.ne.s32.totalorder %s40_s20, %s263_s21  ;;  %p269_p2 = scmp.lt.s32.totalorder %s263_s21, %s263_s21 }
   0x7   :  { %p270_p3 = por %p269_p2, %p268_p1 }
   0x9   :  { %p271_p4 = pnand %p270_p3, %p264_p0 }
   0xb   :  { %274 = shalt.err (!%p271_p4)
}
   0xc   :  { %s357_s22 = smov [#allocation8]   ;;  %s358_s23 = smov [#allocation2]  }
   0xd   :  { %42 = dma.vmem_to_smem %s40_s20, 16, %s357_s22, [#allocation9]  }
   0xe   :  { %22 = dma.hbm_to_smem %s431_s0, 16, %s358_s23, [#allocation5]  }
   0xf   :  { %s29_s2 = sshll.u32 %s432_s1, 4  ;;  %s49_s30 = sshll.u32 %s434_s3, 4  ;;  %s30_s2 = int_to_ptr.vmem [resolvable:$true] %s29_s2  ;;  %s50_s30 = int_to_ptr.vmem [resolvable:$true] %s49_s30 }
  0x10   :  { %s283_s6 = scalar_lea.vmem %s30_s2, 16  ;;  %p288_p6 = scmp.lt.s32.totalorder %s30_s2, %s30_s2 }
  0x11   :  { %p284_p5 = scmp.ne.s32.totalorder %s30_s2, %s283_s6  ;;  %p289_p7 = scmp.lt.s32.totalorder %s283_s6, %s283_s6 }
  0x13   :  { %p290_p8 = por %p289_p7, %p288_p6 }
  0x15   :  { %p291_p9 = pnand %p290_p8, %p284_p5 }
  0x17   :  { %294 = shalt.err (!%p291_p9)
}
  0x18   :  { %s359_s7 = smov [#allocation7]   ;;  %s295_s0 = scalar_lea.vmem %s50_s30, 16 }
  0x19   :  { %32 = dma.vmem_to_smem %s30_s2, 16, %s359_s7, [#allocation6]  }
  0x1a   :  { %p296_p10 = scmp.ne.s32.totalorder %s50_s30, %s295_s0  ;;  %p300_p11 = scmp.lt.s32.totalorder %s50_s30, %s50_s30 }
  0x1b   :  { %p301_p12 = scmp.lt.s32.totalorder %s295_s0, %s295_s0 }
  0x1d   :  { %p302_p13 = por %p301_p12, %p300_p11 }
  0x1f   :  { %p303_p0 = pnand %p302_p13, %p296_p10 }
  0x21   :  { %306 = shalt.err (!%p303_p0)
}
  0x22   :  { %s360_s1 = smov [#allocation10]   ;;  %s361_s3 = smov [#allocation11]  }
  0x23   :  { %52 = dma.vmem_to_smem %s50_s30, 16, %s360_s1, [#allocation9]  }
  0x24   :  { %s59_s8 = sshll.u32 %s361_s3, 4  ;;  %s60_s8 = int_to_ptr.vmem [resolvable:$true] %s59_s8 }
  0x25   :  { %s315_s9 = scalar_lea.vmem %s60_s8, 128  ;;  %p320_p2 = scmp.lt.s32.totalorder %s60_s8, %s60_s8 }
  0x26   :  { %p316_p1 = scmp.ne.s32.totalorder %s60_s8, %s315_s9  ;;  %p321_p3 = scmp.lt.s32.totalorder %s315_s9, %s315_s9 }
  0x28   :  { %p322_p4 = por %p321_p3, %p320_p2 }
  0x2a   :  { %p323_p5 = pnand %p322_p4, %p316_p1 }
  0x2c   :  { %326 = shalt.err (!%p323_p5)
}
  0x2d   :  { %62 = dma.hbm_to_vmem [thread:$0]  %s435_s4, 128, %s60_s8, [#allocation3]  }
  0x2e   :  { %347 = dma.done.wait [#allocation5], 16  }
  0x2f   :  { %348 = vsyncadd [#allocation5], 4294967280 }
  0x30   :  { %349 = dma.done.wait [#allocation6], 16  }
  0x31   :  { %350 = vsyncadd [#allocation6], 4294967280 }
  0x32   :  { %351 = dma.done.wait [#allocation9], 32  }
  0x33   :  { %352 = vsyncadd [#allocation9], 4294967264 }
  0x34   :  { %353 = dma.done.wait [#allocation3], 128  }
  0x35   :  { %354 = vsyncadd [#allocation3], 4294967168 }
  0x36   :  { %78 = sfence }
  0x37   :  { %s80_s12 = sld [smem:[#allocation2]]  ;;  %v410_v0 = vld [vmem:[#allocation11] sm:$0xff] }
  0x38   :  { %s83_s13 = sld [smem:[#allocation7]] }
  0x39   :  { %s86_s14 = sld [smem:[#allocation8]] }
  0x3a   :  { %s89_s15 = sld [smem:[#allocation10]] }
  0x3b   :  { %s227_s16 = sld [smem:[#allocation2 + $0x1]] }
  0x3c   :  { %s228_s17 = sld [smem:[#allocation7 + $0x1]] }
  0x3d   :  { %v81_v1 = vstv %s80_s12  ;;  %s229_s18 = sld [smem:[#allocation8 + $0x1]] }
  0x3e   :  { %v82_v2 = vmul.f32 %v81_v1, %v410_v0  ;;  %v84_v3 = vstv %s83_s13  ;;  %s230_s4 = sld [smem:[#allocation10 + $0x1]] }
  0x3f   :  { %v87_v4 = vstv %s86_s14  ;;  %s231_s19 = sld [smem:[#allocation2 + $0x2]]  ;;  %s362_s14 = smov [#allocation12]  }
  0x40   :  { %v85_v5 = vadd.f32 %v84_v3, %v82_v2  ;;  %v88_v6 = vmul.f32 %v87_v4, %v410_v0  ;;  %v90_v7 = vstv %s89_s15  ;;  %s232_s20 = sld [smem:[#allocation7 + $0x2]]  ;;  %s212_s15 = sshll.u32 %s362_s14, 4  ;;  %s213_s15 = int_to_ptr.vmem [resolvable:$true] %s212_s15 }
  0x41   :  { %v96_v8 = vstv %s227_s16  ;;  %s233_s21 = sld [smem:[#allocation8 + $0x2]]  ;;  %s327_s16 = scalar_lea.vmem %s213_s15, 1024 }
  0x42   :  { %v91_v9 = vadd.f32 %v90_v7, %v88_v6  ;;  %v97_v10 = vmul.f32 %v96_v8, %v410_v0  ;;  %v99_v11 = vstv %s228_s17  ;;  %s234_s22 = sld [smem:[#allocation10 + $0x2]]  ;;  %p328_p6 = scmp.ne.s32.totalorder %s213_s15, %s327_s16 }
  0x43   :  { %v102_v12 = vstv %s229_s18  ;;  %s235_s23 = sld [smem:[#allocation2 + $0x3]]  ;;  %p332_p7 = scmp.lt.s32.totalorder %s213_s15, %s213_s15 }
  0x44   :  { %v92_v13 = vmin.f32 %v85_v5, %v91_v9  ;;  %v100_v14 = vadd.f32 %v99_v11, %v97_v10  ;;  %v103_v15 = vmul.f32 %v102_v12, %v410_v0  ;;  %v105_v16 = vstv %s230_s4  ;;  %s236_s24 = sld [smem:[#allocation7 + $0x3]]  ;;  %p333_p8 = scmp.lt.s32.totalorder %s327_s16, %s327_s16 }
  0x45   :  { %v112_v17 = vstv %s231_s19  ;;  %s237_s25 = sld [smem:[#allocation8 + $0x3]] }
  0x46   :  { %v93_v18 = vmax.f32 %v92_v13, 0.0  ;;  %v106_v19 = vadd.f32 %v105_v16, %v103_v15  ;;  %v113_v20 = vmul.f32 %v112_v17, %v410_v0  ;;  %v115_v21 = vstv %s232_s20  ;;  %s238_s26 = sld [smem:[#allocation10 + $0x3]]  ;;  %p334_p9 = por %p333_p8, %p332_p7 }
  0x47   :  { %v118_v22 = vstv %s233_s21  ;;  %s239_s27 = sld [smem:[#allocation2 + $0x4]] }
  0x48   :  { %94 = vst [vmem:[#allocation12] sm:$0xff] %v93_v18  ;;  %v107_v23 = vmin.f32 %v100_v14, %v106_v19  ;;  %v116_v24 = vadd.f32 %v115_v21, %v113_v20  ;;  %v119_v25 = vmul.f32 %v118_v22, %v410_v0  ;;  %v121_v26 = vstv %s234_s22  ;;  %s240_s2 = sld [smem:[#allocation7 + $0x4]]  ;;  %p335_p10 = pnand %p334_p9, %p328_p6 }
  0x49   :  { %v128_v27 = vstv %s235_s23  ;;  %s241_s28 = sld [smem:[#allocation8 + $0x4]] }
  0x4a   :  { %v108_v28 = vmax.f32 %v107_v23, 0.0  ;;  %v122_v29 = vadd.f32 %v121_v26, %v119_v25  ;;  %v129_v30 = vmul.f32 %v128_v27, %v410_v0  ;;  %v131_v31 = vstv %s236_s24  ;;  %s242_s29 = sld [smem:[#allocation10 + $0x4]] }
  0x4b   :  { %v134_v32 = vstv %s237_s25  ;;  %s243_s30 = sld [smem:[#allocation2 + $0x5]] }
  0x4c   :  { %110 = vst [vmem:[#allocation12 + $0x8] sm:$0xff] %v108_v28  ;;  %v123_v33 = vmin.f32 %v116_v24, %v122_v29  ;;  %v132_v34 = vadd.f32 %v131_v31, %v129_v30  ;;  %v135_v35 = vmul.f32 %v134_v32, %v410_v0  ;;  %v137_v36 = vstv %s238_s26  ;;  %s244_s6 = sld [smem:[#allocation7 + $0x5]] }
  0x4d   :  { %v144_v37 = vstv %s239_s27  ;;  %s245_s7 = sld [smem:[#allocation8 + $0x5]] }
  0x4e   :  { %v124_v38 = vmax.f32 %v123_v33, 0.0  ;;  %v138_v39 = vadd.f32 %v137_v36, %v135_v35  ;;  %v145_v40 = vmul.f32 %v144_v37, %v410_v0  ;;  %v147_v41 = vstv %s240_s2  ;;  %s246_s0 = sld [smem:[#allocation10 + $0x5]] }
  0x4f   :  { %v150_v42 = vstv %s241_s28  ;;  %s247_s1 = sld [smem:[#allocation2 + $0x6]] }
  0x50   :  { %126 = vst [vmem:[#allocation12 + $0x10] sm:$0xff] %v124_v38  ;;  %v139_v43 = vmin.f32 %v132_v34, %v138_v39  ;;  %v148_v44 = vadd.f32 %v147_v41, %v145_v40  ;;  %v151_v45 = vmul.f32 %v150_v42, %v410_v0  ;;  %v153_v46 = vstv %s242_s29  ;;  %s248_s3 = sld [smem:[#allocation7 + $0x6]] }
  0x51   :  { %v160_v47 = vstv %s243_s30  ;;  %s249_s8 = sld [smem:[#allocation8 + $0x6]] }
  0x52   :  { %v140_v48 = vmax.f32 %v139_v43, 0.0  ;;  %v154_v49 = vadd.f32 %v153_v46, %v151_v45  ;;  %v161_v50 = vmul.f32 %v160_v47, %v410_v0  ;;  %v163_v51 = vstv %s244_s6  ;;  %s250_s9 = sld [smem:[#allocation10 + $0x6]] }
  0x53   :  { %v166_v52 = vstv %s245_s7  ;;  %s251_s10 = sld [smem:[#allocation2 + $0x7]] }
  0x54   :  { %142 = vst [vmem:[#allocation12 + $0x18] sm:$0xff] %v140_v48  ;;  %v155_v53 = vmin.f32 %v148_v44, %v154_v49  ;;  %v164_v54 = vadd.f32 %v163_v51, %v161_v50  ;;  %v167_v55 = vmul.f32 %v166_v52, %v410_v0  ;;  %v169_v56 = vstv %s246_s0  ;;  %s252_s11 = sld [smem:[#allocation7 + $0x7]] }
  0x55   :  { %v176_v57 = vstv %s247_s1  ;;  %s253_s12 = sld [smem:[#allocation8 + $0x7]] }
  0x56   :  { %v156_v58 = vmax.f32 %v155_v53, 0.0  ;;  %v170_v59 = vadd.f32 %v169_v56, %v167_v55  ;;  %v177_v60 = vmul.f32 %v176_v57, %v410_v0  ;;  %v179_v61 = vstv %s248_s3  ;;  %s254_s13 = sld [smem:[#allocation10 + $0x7]] }
  0x57   :  { %v182_v62 = vstv %s249_s8 }
  0x58   :  { %158 = vst [vmem:[#allocation12 + $0x20] sm:$0xff] %v156_v58  ;;  %v171_v63 = vmin.f32 %v164_v54, %v170_v59  ;;  %v180_v1 = vadd.f32 %v179_v61, %v177_v60  ;;  %v183_v2 = vmul.f32 %v182_v62, %v410_v0  ;;  %v185_v3 = vstv %s250_s9 }
  0x59   :  { %v192_v4 = vstv %s251_s10 }
  0x5a   :  { %v172_v5 = vmax.f32 %v171_v63, 0.0  ;;  %v186_v6 = vadd.f32 %v185_v3, %v183_v2  ;;  %v193_v7 = vmul.f32 %v192_v4, %v410_v0  ;;  %v195_v8 = vstv %s252_s11 }
  0x5b   :  { %v198_v9 = vstv %s253_s12 }
  0x5c   :  { %174 = vst [vmem:[#allocation12 + $0x28] sm:$0xff] %v172_v5  ;;  %v187_v10 = vmin.f32 %v180_v1, %v186_v6  ;;  %v196_v11 = vadd.f32 %v195_v8, %v193_v7  ;;  %v199_v12 = vmul.f32 %v198_v9, %v410_v0  ;;  %v201_v13 = vstv %s254_s13 }
  0x5e   :  { %v188_v14 = vmax.f32 %v187_v10, 0.0  ;;  %v202_v15 = vadd.f32 %v201_v13, %v199_v12 }
  0x60   :  { %190 = vst [vmem:[#allocation12 + $0x30] sm:$0xff] %v188_v14  ;;  %v203_v16 = vmin.f32 %v196_v11, %v202_v15 }
  0x62   :  { %v204_v17 = vmax.f32 %v203_v16, 0.0 }
  0x64   :  { %206 = vst [vmem:[#allocation12 + $0x38] sm:$0xff] %v204_v17 }
  0x65   :  { %338 = shalt.err (!%p335_p10)
}
  0x66   :  { %s363_s17 = smov 128   ;;  %s364_s18 = smov 8  }
  0x67   :  { %218 = dma.vmem_to_hbm [thread:$0]  %s213_s15, 1024, %s436_s5, [#allocation4], %s363_s17, %s363_s17, %s364_s18  }
  0x68   :  { %355 = dma.done.wait [#allocation4], 1024  }
  0x69   :  { %356 = vsyncadd [#allocation4], 4294966272 }
  0x6a   :  { %222 = vsyncpa [#allocation3], 1 }
  0x6b   :  { %223 = vsyncpa [#allocation4], 1 }
  0x6c   :  { %224 = vsyncpa [#allocation5], 1 }
  0x6d   :  { %225 = vsyncpa [#allocation6], 1 }
  0x6e   :  { %226 = vsyncpa [#allocation9], 1 }

</bundles_post_ra>
